<compile_context>
chip_gen: v7x
topology: tpu7x:2x2x1
jax: 0.10.0
libtpu: 0.0.40
codegen_flags: <defaults>
</compile_context>

<pallas_src>
import functools

import jax
import jax.numpy as jnp
from jax.experimental import pallas as pl
from jax.experimental.pallas import tpu as pltpu

P_DROP = 0.1


def _dropout_add_kernel(x_ref, r_ref, bits_ref, o_ref, *, keep_threshold, scale):
    # x_ref, r_ref, o_ref: (S, H) f32 blocks; bits_ref: (S, H) uint32 block.
    x = x_ref[...]
    keep = bits_ref[...] < jnp.uint32(keep_threshold)       # P(keep) = 1 - p
    o_ref[...] = jnp.where(keep, x * jnp.float32(scale), jnp.float32(0.0)) + r_ref[...]


def _add_kernel(x_ref, r_ref, o_ref):
    o_ref[...] = x_ref[...] + r_ref[...]


def dropout_add(x, residual, key, *, p=P_DROP, training=True):
    """dropout(x, p) + residual — semantics of nn.Dropout(p) followed by add."""
    B, S, H = x.shape
    assert residual.shape == x.shape
    assert B == 1 and S % 8 == 0 and H % 128 == 0

    x2 = x.reshape(S, H)
    r2 = residual.reshape(S, H)

    full_spec = pl.BlockSpec((S, H), lambda i: (0, 0))
    out_shape = jax.ShapeDtypeStruct((S, H), x.dtype)
    compiler_params = pltpu.CompilerParams(dimension_semantics=("parallel",))

    if training and p > 0.0:
        # Dropout mask randomness: uint32 bits compared against an integer
        # threshold, keep-prob = (1 - p); survivors scaled by 1 / (1 - p).
        bits = jax.random.bits(key, (S, H), dtype=jnp.uint32)
        keep_threshold = min(int(round((1.0 - p) * 2.0**32)), 2**32 - 1)
        kernel = functools.partial(
            _dropout_add_kernel,
            keep_threshold=keep_threshold,
            scale=1.0 / (1.0 - p),
        )
        out = pl.pallas_call(
            kernel,
            out_shape=out_shape,
            grid=(1,),
            in_specs=[full_spec, full_spec, full_spec],
            out_specs=full_spec,
            compiler_params=compiler_params,
        )(x2, r2, bits)
    else:
        out = pl.pallas_call(
            _add_kernel,
            out_shape=out_shape,
            grid=(1,),
            in_specs=[full_spec, full_spec],
            out_specs=full_spec,
            compiler_params=compiler_params,
        )(x2, r2)

    return out.reshape(B, S, H)


if __name__ == "__main__":
    root = jax.random.PRNGKey(0)
    k1, k2, kmask = jax.random.split(root, 3)

    # Shapes implied by the module: (1, 384, 256) float32
    x104 = jax.random.normal(k1, (1, 384, 256), dtype=jnp.float32)
    x71 = jax.random.normal(k2, (1, 384, 256), dtype=jnp.float32)

    out = jax.block_until_ready(
        dropout_add(x104, x71, kmask, p=P_DROP, training=True))
    assert out.shape == (1, 384, 256) and out.dtype == jnp.float32

    # Eval-mode (identity dropout) path is exact.
    out_eval = jax.block_until_ready(
        dropout_add(x104, x71, kmask, p=P_DROP, training=False))
    assert jnp.allclose(out_eval, x104 + x71, atol=1e-6)

    # Training-mode sanity: every element is either residual (dropped) or
    # x / (1 - p) + residual (kept), and roughly 90% are kept.
    kept_val = x104 / (1.0 - P_DROP) + x71
    dropped_val = x71
    close_kept = jnp.isclose(out, kept_val, atol=1e-5)
    close_dropped = jnp.isclose(out, dropped_val, atol=1e-5)
    assert bool(jnp.all(close_kept | close_dropped))
    keep_frac = float(jnp.mean(close_kept))
    assert 0.85 <= keep_frac <= 0.95, keep_frac

    print("KERNEL_OK")
</pallas_src>

<mosaic_0001>
module attributes {stable_mosaic.version = 11 : i64} {
  func.func @_dropout_add_kernel(%arg0: i32, %arg1: memref<384x256xf32, #tpu.memory_space<vmem>>, %arg2: memref<384x256xf32, #tpu.memory_space<vmem>>, %arg3: memref<384x256xi32, #tpu.memory_space<vmem>>, %arg4: memref<384x256xf32, #tpu.memory_space<vmem>>) attributes {dimension_semantics = [#tpu.dimension_semantics<parallel>], iteration_bounds = array<i64: 1>, scalar_prefetch = 0 : i64, scratch_operands = 0 : i64, tpu.core_type = #tpu.core_type<tc>, window_params = [{pipeline_mode = #tpu.pipeline_mode<synchronous>, transform_indices = @transform_0, window_bounds = array<i64: 384, 256>}, {pipeline_mode = #tpu.pipeline_mode<synchronous>, transform_indices = @transform_1, window_bounds = array<i64: 384, 256>}, {pipeline_mode = #tpu.pipeline_mode<synchronous>, transform_indices = @transform_2, window_bounds = array<i64: 384, 256>}, {pipeline_mode = #tpu.pipeline_mode<synchronous>, transform_indices = @transform_3, window_bounds = array<i64: 384, 256>}]} {
    %c0 = arith.constant 0 : index
    %c0_0 = arith.constant 0 : index
    %0 = vector.load %arg1[%c0, %c0_0] : memref<384x256xf32, #tpu.memory_space<vmem>>, vector<384x256xf32>
    %c0_1 = arith.constant 0 : index
    %c0_2 = arith.constant 0 : index
    %1 = vector.load %arg3[%c0_1, %c0_2] : memref<384x256xi32, #tpu.memory_space<vmem>>, vector<384x256xi32>
    %c-429496730_i32 = arith.constant -429496730 : i32
    %2 = vector.broadcast %c-429496730_i32 : i32 to vector<384x256xi32>
    %3 = arith.cmpi ult, %1, %2 : vector<384x256xi32>
    %cst = arith.constant 1.11111116 : f32
    %4 = vector.broadcast %cst : f32 to vector<384x256xf32>
    %5 = arith.mulf %0, %4 : vector<384x256xf32>
    %cst_3 = arith.constant 0.000000e+00 : f32
    %6 = vector.broadcast %cst_3 : f32 to vector<384x256xf32>
    %7 = arith.select %3, %5, %6 : vector<384x256xi1>, vector<384x256xf32>
    %c0_4 = arith.constant 0 : index
    %c0_5 = arith.constant 0 : index
    %8 = vector.load %arg2[%c0_4, %c0_5] : memref<384x256xf32, #tpu.memory_space<vmem>>, vector<384x256xf32>
    %9 = arith.addf %7, %8 : vector<384x256xf32>
    %c0_6 = arith.constant 0 : index
    %c0_7 = arith.constant 0 : index
    %10 = vector.load %arg4[%c0_6, %c0_7] : memref<384x256xf32, #tpu.memory_space<vmem>>, vector<384x256xf32>
    tpu.vector_store %arg4[%c0_6, %c0_7], %9 {strides = array<i32>} : memref<384x256xf32, #tpu.memory_space<vmem>>, vector<384x256xf32>,
    return
  }
  func.func @transform_0(%arg0: i32) -> (i32, i32) {
    %c0_i32 = arith.constant 0 : i32
    %c0_i32_0 = arith.constant 0 : i32
    %c0_i32_1 = arith.constant 0 : i32
    return %c0_i32, %c0_i32_0 : i32, i32
  }
  func.func @transform_1(%arg0: i32) -> (i32, i32) {
    %c0_i32 = arith.constant 0 : i32
    %c0_i32_0 = arith.constant 0 : i32
    %c0_i32_1 = arith.constant 0 : i32
    return %c0_i32, %c0_i32_0 : i32, i32
  }
  func.func @transform_2(%arg0: i32) -> (i32, i32) {
    %c0_i32 = arith.constant 0 : i32
    %c0_i32_0 = arith.constant 0 : i32
    %c0_i32_1 = arith.constant 0 : i32
    return %c0_i32, %c0_i32_0 : i32, i32
  }
  func.func @transform_3(%arg0: i32) -> (i32, i32) {
    %c0_i32 = arith.constant 0 : i32
    %c0_i32_0 = arith.constant 0 : i32
    %c0_i32_1 = arith.constant 0 : i32
    return %c0_i32, %c0_i32_0 : i32, i32
  }
}

</mosaic_0001>

<bundles_post_ra>
// kernel: tpu_custom_call.1
= control target key start
LH: loop header
LB: loop body
LE: loop exit
PB: predicated region body
PF: predicated region fallthrough
CT: control target
= control target key end

     0   :  { %8 = vsyncpa [#allocation3], 0  ;;  %s1035_s0 = inlined_call_operand.hbm [shape: f32[384,256], index: 0, kind: input, shape index: {}]   ;;  %s1036_s1 = inlined_call_operand.hbm [shape: f32[384,256], index: 1, kind: input, shape index: {}]   ;;  %s1037_s2 = inlined_call_operand.hbm [shape: u32[384,256], index: 2, kind: input, shape index: {}]   ;;  %s1038_s3 = inlined_call_operand.hbm [shape: f32[384,256], index: 3, kind: output, shape index: {}]  }
   0x1   :  { %9 = vsyncpa [#allocation6], 0 }
   0x2   :  { %10 = vsyncpa [#allocation4], 0  ;;  %s942_s12 = smov [#allocation5]   ;;  %s943_s14 = smov [#allocation2]  }
   0x3   :  { %s28_s13 = sshll.u32 %s942_s12, 4  ;;  %s16_s15 = sshll.u32 %s943_s14, 4  ;;  %s29_s13 = int_to_ptr.vmem [resolvable:$true] %s28_s13  ;;  %s968_s15 = int_to_ptr.vmem [resolvable:$true] %s16_s15 }
   0x4   :  { %s848_s18 = scalar_lea.hbm %s1036_s1, 12288 }
   0x5   :  { %p849_p0 = scmp.ne.s32.totalorder %s1036_s1, %s848_s18  ;;  %p852_p1 = scmp.lt.u32.totalorder %s848_s18, %s1036_s1 }
   0x7   :  { %p854_p2 = pnand %p852_p1, %p849_p0 }
   0x9   :  { %857 = shalt.err (!%p854_p2)
}
   0xa   :  { %s858_s23 = scalar_lea.vmem %s29_s13, 12288  ;;  %p863_p4 = scmp.lt.s32.totalorder %s29_s13, %s29_s13 }
   0xb   :  { %p859_p3 = scmp.ne.s32.totalorder %s29_s13, %s858_s23  ;;  %p864_p5 = scmp.lt.s32.totalorder %s858_s23, %s858_s23 }
   0xd   :  { %p865_p6 = por %p864_p5, %p863_p4 }
   0xf   :  { %p866_p7 = pnand %p865_p6, %p859_p3 }
  0x11   :  { %869 = shalt.err (!%p866_p7)
}
  0x12   :  { %s944_s24 = smov 256   ;;  %s945_s25 = smov 16  }
  0x13   :  { %34 = dma.hbm_to_vmem [thread:$0]  %s1036_s1, 12288, %s29_s13, [#allocation6], %s944_s24, %s944_s24, %s945_s25  }
  0x14   :  { %s870_s30 = scalar_lea.hbm %s1035_s0, 12288 }
  0x15   :  { %p871_p8 = scmp.ne.s32.totalorder %s1035_s0, %s870_s30  ;;  %p874_p9 = scmp.lt.u32.totalorder %s870_s30, %s1035_s0 }
  0x17   :  { %p876_p10 = pnand %p874_p9, %p871_p8 }
  0x19   :  { %879 = shalt.err (!%p876_p10)
}
  0x1a   :  { %s880_s8 = scalar_lea.vmem %s968_s15, 12288  ;;  %p885_p12 = scmp.lt.s32.totalorder %s968_s15, %s968_s15 }
  0x1b   :  { %p881_p11 = scmp.ne.s32.totalorder %s968_s15, %s880_s8  ;;  %p886_p13 = scmp.lt.s32.totalorder %s880_s8, %s880_s8 }
  0x1d   :  { %p887_p0 = por %p886_p13, %p885_p12 }
  0x1f   :  { %p888_p1 = pnand %p887_p0, %p881_p11 }
  0x21   :  { %891 = shalt.err (!%p888_p1)
}
  0x22   :  { %22 = dma.hbm_to_vmem [thread:$0]  %s1035_s0, 12288, %s968_s15, [#allocation3], %s944_s24, %s944_s24, %s945_s25  }
  0x23   :  { %s946_s10 = smov [#allocation7]   ;;  %s892_s14 = scalar_lea.hbm %s1037_s2, 12288 }
  0x24   :  { %s40_s11 = sshll.u32 %s946_s10, 4  ;;  %p893_p2 = scmp.ne.s32.totalorder %s1037_s2, %s892_s14  ;;  %s41_s11 = int_to_ptr.vmem [resolvable:$true] %s40_s11 }
  0x25   :  { %p896_p3 = scmp.lt.u32.totalorder %s892_s14, %s1037_s2 }
  0x27   :  { %p898_p4 = pnand %p896_p3, %p893_p2 }
  0x29   :  { %901 = shalt.err (!%p898_p4)
}
  0x2a   :  { %s902_s20 = scalar_lea.vmem %s41_s11, 12288  ;;  %p907_p6 = scmp.lt.s32.totalorder %s41_s11, %s41_s11 }
  0x2b   :  { %p903_p5 = scmp.ne.s32.totalorder %s41_s11, %s902_s20  ;;  %p908_p7 = scmp.lt.s32.totalorder %s902_s20, %s902_s20 }
  0x2d   :  { %p909_p8 = por %p908_p7, %p907_p6 }
  0x2f   :  { %p910_p9 = pnand %p909_p8, %p903_p5 }
  0x31   :  { %913 = shalt.err (!%p910_p9)
}
  0x32   :  { %46 = dma.hbm_to_vmem [thread:$0]  %s1037_s2, 12288, %s41_s11, [#allocation6], %s944_s24, %s944_s24, %s945_s25  }
  0x33   :  { %936 = dma.done.wait [#allocation3], 12288  }
  0x34   :  { %937 = vsyncadd [#allocation3], 4294955008 }
  0x35   :  { %938 = dma.done.wait [#allocation6], 24576  }
  0x36   :  { %939 = vsyncadd [#allocation6], 4294942720  ;;  %v56_v0 = vld [vmem:[#allocation2] sm:$0xff]  ;;  %v57_v4 = vld [vmem:[#allocation2 + $0x8] sm:$0xff]  ;;  %s947_s2 = smov [#allocation8]  }
  0x37   :  { %v152_v1 = vld [vmem:[#allocation7] sm:$0xff]  ;;  %v344_v3 = vmul.f32 1.1111112, %v56_v0  ;;  %v153_v5 = vld [vmem:[#allocation7 + $0x8] sm:$0xff]  ;;  %v345_v6 = vmul.f32 1.1111112, %v57_v4 }
  0x38   :  { %v536_v2 = vld [vmem:[#allocation5] sm:$0xff]  ;;  %vm248_vm0 = vcmp.lt.u32.totalorder %v152_v1, 3865470566  ;;  %vm249_vm1 = vcmp.lt.u32.totalorder %v153_v5, 3865470566  ;;  %v537_v7 = vld [vmem:[#allocation5 + $0x8] sm:$0xff] }
  0x39   :  { %v58_v8 = vld [vmem:[#allocation2 + $0x10] sm:$0xff]  ;;  %v440_v9 = vsel %vm248_vm0, %v344_v3, 0.0  ;;  %v59_v13 = vld [vmem:[#allocation2 + $0x18] sm:$0xff]  ;;  %v441_v15 = vsel %vm249_vm1, %v345_v6, 0.0  ;;  %v60_v21 = vld [vmem:[#allocation2 + $0x20] sm:$0xff]  ;;  %s829_s21 = sshll.u32 %s947_s2, 4  ;;  %s830_s21 = int_to_ptr.vmem [resolvable:$true] %s829_s21 }
  0x3a   :  { %v154_v10 = vld [vmem:[#allocation7 + $0x10] sm:$0xff]  ;;  %v346_v11 = vmul.f32 1.1111112, %v58_v8  ;;  %v632_v14 = vadd.f32 %v536_v2, %v440_v9  ;;  %v155_v16 = vld [vmem:[#allocation7 + $0x18] sm:$0xff]  ;;  %v347_v17 = vmul.f32 1.1111112, %v59_v13  ;;  %v633_v18 = vadd.f32 %v537_v7, %v441_v15  ;;  %p919_p11 = scmp.lt.s32.totalorder %s830_s21, %s830_s21 }
  0x3b   :  { %v538_v12 = vld [vmem:[#allocation5 + $0x10] sm:$0xff]  ;;  %vm250_vm2 = vcmp.lt.u32.totalorder %v154_v10, 3865470566  ;;  %vm251_vm3 = vcmp.lt.u32.totalorder %v155_v16, 3865470566  ;;  %v539_v20 = vld [vmem:[#allocation5 + $0x18] sm:$0xff] }
  0x3c   :  { %v442_v19 = vsel %vm250_vm2, %v346_v11, 0.0  ;;  %v156_v22 = vld [vmem:[#allocation7 + $0x20] sm:$0xff]  ;;  %728 = vst [vmem:[#allocation8] sm:$0xff] %v632_v14  ;;  %v443_v24 = vsel %vm251_vm3, %v347_v17, 0.0  ;;  %v348_v25 = vmul.f32 1.1111112, %v60_v21 }
  0x3d   :  { %v634_v23 = vadd.f32 %v538_v12, %v442_v19  ;;  %vm252_vm4 = vcmp.lt.u32.totalorder %v156_v22, 3865470566  ;;  %v540_v26 = vld [vmem:[#allocation5 + $0x20] sm:$0xff]  ;;  %729 = vst [vmem:[#allocation8 + $0x8] sm:$0xff] %v633_v18  ;;  %v635_v27 = vadd.f32 %v539_v20, %v443_v24  ;;  %v61_v28 = vld [vmem:[#allocation2 + $0x28] sm:$0xff]  ;;  %v62_v33 = vld [vmem:[#allocation2 + $0x30] sm:$0xff] }
  0x3e   :  { %v157_v29 = vld [vmem:[#allocation7 + $0x28] sm:$0xff]  ;;  %v444_v31 = vsel %vm252_vm4, %v348_v25, 0.0  ;;  %v349_v32 = vmul.f32 1.1111112, %v61_v28  ;;  %v158_v35 = vld [vmem:[#allocation7 + $0x30] sm:$0xff]  ;;  %v63_v38 = vld [vmem:[#allocation2 + $0x38] sm:$0xff] }
  0x3f   :  { %v541_v30 = vld [vmem:[#allocation5 + $0x28] sm:$0xff]  ;;  %730 = vst [vmem:[#allocation8 + $0x10] sm:$0xff] %v634_v23  ;;  %vm253_vm5 = vcmp.lt.u32.totalorder %v157_v29, 3865470566  ;;  %731 = vst [vmem:[#allocation8 + $0x18] sm:$0xff] %v635_v27  ;;  %v636_v34 = vadd.f32 %v540_v26, %v444_v31  ;;  %v542_v37 = vld [vmem:[#allocation5 + $0x30] sm:$0xff] }
  0x40   :  { %v350_v36 = vmul.f32 1.1111112, %v62_v33  ;;  %v445_v39 = vsel %vm253_vm5, %v349_v32, 0.0  ;;  %vm254_vm6 = vcmp.lt.u32.totalorder %v158_v35, 3865470566  ;;  %v159_v40 = vld [vmem:[#allocation7 + $0x38] sm:$0xff] }
  0x41   :  { %v351_v41 = vmul.f32 1.1111112, %v63_v38  ;;  %732 = vst [vmem:[#allocation8 + $0x20] sm:$0xff] %v636_v34  ;;  %v637_v42 = vadd.f32 %v541_v30, %v445_v39  ;;  %vm255_vm7 = vcmp.lt.u32.totalorder %v159_v40, 3865470566  ;;  %v543_v44 = vld [vmem:[#allocation5 + $0x38] sm:$0xff] }
  0x42   :  { %v446_v43 = vsel %vm254_vm6, %v350_v36, 0.0  ;;  %v64_v45 = vld [vmem:[#allocation2 + $0x40] sm:$0xff]  ;;  %v65_v52 = vld [vmem:[#allocation2 + $0x48] sm:$0xff]  ;;  %v66_v57 = vld [vmem:[#allocation2 + $0x50] sm:$0xff]  ;;  %s914_s22 = scalar_lea.vmem %s830_s21, 12288 }
  0x43   :  { %v160_v46 = vld [vmem:[#allocation7 + $0x40] sm:$0xff]  ;;  %v638_v47 = vadd.f32 %v542_v37, %v446_v43  ;;  %v447_v48 = vsel %vm255_vm7, %v351_v41, 0.0  ;;  %v352_v49 = vmul.f32 1.1111112, %v64_v45  ;;  %733 = vst [vmem:[#allocation8 + $0x28] sm:$0xff] %v637_v42  ;;  %v161_v53 = vld [vmem:[#allocation7 + $0x48] sm:$0xff]  ;;  %p915_p10 = scmp.ne.s32.totalorder %s830_s21, %s914_s22  ;;  %p920_p12 = scmp.lt.s32.totalorder %s914_s22, %s914_s22 }
  0x44   :  { %vm256_vm8 = vcmp.lt.u32.totalorder %v160_v46, 3865470566  ;;  %v544_v50 = vld [vmem:[#allocation5 + $0x40] sm:$0xff]  ;;  %v639_v51 = vadd.f32 %v543_v44, %v447_v48  ;;  %v545_v54 = vld [vmem:[#allocation5 + $0x48] sm:$0xff]  ;;  %vm257_vm9 = vcmp.lt.u32.totalorder %v161_v53, 3865470566 }
  0x45   :  { %734 = vst [vmem:[#allocation8 + $0x30] sm:$0xff] %v638_v47  ;;  %v448_v55 = vsel %vm256_vm8, %v352_v49, 0.0  ;;  %v353_v56 = vmul.f32 1.1111112, %v65_v52  ;;  %v162_v59 = vld [vmem:[#allocation7 + $0x50] sm:$0xff]  ;;  %v67_v62 = vld [vmem:[#allocation2 + $0x58] sm:$0xff]  ;;  %p921_p13 = por %p920_p12, %p919_p11 }
  0x46   :  { %735 = vst [vmem:[#allocation8 + $0x38] sm:$0xff] %v639_v51  ;;  %v640_v58 = vadd.f32 %v544_v50, %v448_v55  ;;  %v354_v60 = vmul.f32 1.1111112, %v66_v57  ;;  %v546_v61 = vld [vmem:[#allocation5 + $0x50] sm:$0xff]  ;;  %vm258_vm10 = vcmp.lt.u32.totalorder %v162_v59, 3865470566 }
  0x47   :  { %v449_v63 = vsel %vm257_vm9, %v353_v56, 0.0  ;;  %v163_v0 = vld [vmem:[#allocation7 + $0x58] sm:$0xff]  ;;  %v355_v1 = vmul.f32 1.1111112, %v67_v62  ;;  %v68_v5 = vld [vmem:[#allocation2 + $0x60] sm:$0xff]  ;;  %v69_v12 = vld [vmem:[#allocation2 + $0x68] sm:$0xff]  ;;  %p922_p0 = pnand %p921_p13, %p915_p10 }
  0x48   :  { %736 = vst [vmem:[#allocation8 + $0x40] sm:$0xff] %v640_v58  ;;  %v641_v2 = vadd.f32 %v545_v54, %v449_v63  ;;  %v450_v3 = vsel %vm258_vm10, %v354_v60, 0.0  ;;  %vm259_vm11 = vcmp.lt.u32.totalorder %v163_v0, 3865470566  ;;  %v547_v4 = vld [vmem:[#allocation5 + $0x58] sm:$0xff]  ;;  %v164_v6 = vld [vmem:[#allocation7 + $0x60] sm:$0xff] }
  0x49   :  { %v642_v7 = vadd.f32 %v546_v61, %v450_v3  ;;  %v451_v8 = vsel %vm259_vm11, %v355_v1, 0.0  ;;  %vm260_vm12 = vcmp.lt.u32.totalorder %v164_v6, 3865470566  ;;  %v356_v9 = vmul.f32 1.1111112, %v68_v5  ;;  %v548_v10 = vld [vmem:[#allocation5 + $0x60] sm:$0xff] }
  0x4a   :  { %737 = vst [vmem:[#allocation8 + $0x48] sm:$0xff] %v641_v2  ;;  %v643_v11 = vadd.f32 %v547_v4, %v451_v8  ;;  %v165_v13 = vld [vmem:[#allocation7 + $0x68] sm:$0xff]  ;;  %v357_v16 = vmul.f32 1.1111112, %v69_v12  ;;  %v70_v17 = vld [vmem:[#allocation2 + $0x70] sm:$0xff]  ;;  %v71_v22 = vld [vmem:[#allocation2 + $0x78] sm:$0xff] }
  0x4b   :  { %v549_v14 = vld [vmem:[#allocation5 + $0x68] sm:$0xff]  ;;  %738 = vst [vmem:[#allocation8 + $0x50] sm:$0xff] %v642_v7  ;;  %v452_v15 = vsel %vm260_vm12, %v356_v9, 0.0  ;;  %vm261_vm13 = vcmp.lt.u32.totalorder %v165_v13, 3865470566  ;;  %v166_v19 = vld [vmem:[#allocation7 + $0x70] sm:$0xff] }
  0x4c   :  { %739 = vst [vmem:[#allocation8 + $0x58] sm:$0xff] %v643_v11  ;;  %v644_v18 = vadd.f32 %v548_v10, %v452_v15  ;;  %v358_v20 = vmul.f32 1.1111112, %v70_v17  ;;  %v550_v21 = vld [vmem:[#allocation5 + $0x70] sm:$0xff]  ;;  %v453_v23 = vsel %vm261_vm13, %v357_v16, 0.0  ;;  %v167_v24 = vld [vmem:[#allocation7 + $0x78] sm:$0xff] }
  0x4d   :  { %vm262_vm14 = vcmp.lt.u32.totalorder %v166_v19, 3865470566  ;;  %v359_v25 = vmul.f32 1.1111112, %v71_v22  ;;  %v645_v26 = vadd.f32 %v549_v14, %v453_v23  ;;  %vm263_vm15 = vcmp.lt.u32.totalorder %v167_v24, 3865470566 }
  0x4e   :  { %740 = vst [vmem:[#allocation8 + $0x60] sm:$0xff] %v644_v18  ;;  %v454_v27 = vsel %vm262_vm14, %v358_v20, 0.0  ;;  %v551_v28 = vld [vmem:[#allocation5 + $0x78] sm:$0xff]  ;;  %v72_v29 = vld [vmem:[#allocation2 + $0x80] sm:$0xff]  ;;  %v73_v36 = vld [vmem:[#allocation2 + $0x88] sm:$0xff] }
  0x4f   :  { %v168_v30 = vld [vmem:[#allocation7 + $0x80] sm:$0xff]  ;;  %v646_v31 = vadd.f32 %v550_v21, %v454_v27  ;;  %v455_v32 = vsel %vm263_vm15, %v359_v25, 0.0  ;;  %v360_v33 = vmul.f32 1.1111112, %v72_v29  ;;  %741 = vst [vmem:[#allocation8 + $0x68] sm:$0xff] %v645_v26  ;;  %v169_v37 = vld [vmem:[#allocation7 + $0x88] sm:$0xff] }
  0x50   :  { %vm264_vm0 = vcmp.lt.u32.totalorder %v168_v30, 3865470566  ;;  %v552_v34 = vld [vmem:[#allocation5 + $0x80] sm:$0xff]  ;;  %v647_v35 = vadd.f32 %v551_v28, %v455_v32  ;;  %v553_v38 = vld [vmem:[#allocation5 + $0x88] sm:$0xff]  ;;  %vm265_vm1 = vcmp.lt.u32.totalorder %v169_v37, 3865470566 }
  0x51   :  { %742 = vst [vmem:[#allocation8 + $0x70] sm:$0xff] %v646_v31  ;;  %v456_v39 = vsel %vm264_vm0, %v360_v33, 0.0  ;;  %v361_v40 = vmul.f32 1.1111112, %v73_v36  ;;  %v74_v41 = vld [vmem:[#allocation2 + $0x90] sm:$0xff]  ;;  %v75_v46 = vld [vmem:[#allocation2 + $0x98] sm:$0xff] }
  0x52   :  { %743 = vst [vmem:[#allocation8 + $0x78] sm:$0xff] %v647_v35  ;;  %v648_v42 = vadd.f32 %v552_v34, %v456_v39  ;;  %v170_v43 = vld [vmem:[#allocation7 + $0x90] sm:$0xff]  ;;  %v362_v44 = vmul.f32 1.1111112, %v74_v41  ;;  %v171_v48 = vld [vmem:[#allocation7 + $0x98] sm:$0xff]  ;;  %v76_v53 = vld [vmem:[#allocation2 + $0xa0] sm:$0xff] }
  0x53   :  { %v554_v45 = vld [vmem:[#allocation5 + $0x90] sm:$0xff]  ;;  %v457_v47 = vsel %vm265_vm1, %v361_v40, 0.0  ;;  %vm266_vm2 = vcmp.lt.u32.totalorder %v170_v43, 3865470566  ;;  %v363_v49 = vmul.f32 1.1111112, %v75_v46 }
  0x54   :  { %744 = vst [vmem:[#allocation8 + $0x80] sm:$0xff] %v648_v42  ;;  %v649_v50 = vadd.f32 %v553_v38, %v457_v47  ;;  %v458_v51 = vsel %vm266_vm2, %v362_v44, 0.0  ;;  %vm267_vm3 = vcmp.lt.u32.totalorder %v171_v48, 3865470566  ;;  %v555_v52 = vld [vmem:[#allocation5 + $0x98] sm:$0xff]  ;;  %v172_v54 = vld [vmem:[#allocation7 + $0xa0] sm:$0xff] }
  0x55   :  { %v650_v55 = vadd.f32 %v554_v45, %v458_v51  ;;  %v459_v56 = vsel %vm267_vm3, %v363_v49, 0.0  ;;  %vm268_vm4 = vcmp.lt.u32.totalorder %v172_v54, 3865470566  ;;  %v364_v57 = vmul.f32 1.1111112, %v76_v53  ;;  %v556_v58 = vld [vmem:[#allocation5 + $0xa0] sm:$0xff] }
  0x56   :  { %745 = vst [vmem:[#allocation8 + $0x88] sm:$0xff] %v649_v50  ;;  %v651_v59 = vadd.f32 %v555_v52, %v459_v56  ;;  %v77_v60 = vld [vmem:[#allocation2 + $0xa8] sm:$0xff]  ;;  %v78_v1 = vld [vmem:[#allocation2 + $0xb0] sm:$0xff]  ;;  %v79_v6 = vld [vmem:[#allocation2 + $0xb8] sm:$0xff] }
  0x57   :  { %v173_v61 = vld [vmem:[#allocation7 + $0xa8] sm:$0xff]  ;;  %746 = vst [vmem:[#allocation8 + $0x90] sm:$0xff] %v650_v55  ;;  %v460_v63 = vsel %vm268_vm4, %v364_v57, 0.0  ;;  %v365_v0 = vmul.f32 1.1111112, %v77_v60  ;;  %v174_v3 = vld [vmem:[#allocation7 + $0xb0] sm:$0xff] }
  0x58   :  { %v557_v62 = vld [vmem:[#allocation5 + $0xa8] sm:$0xff]  ;;  %vm269_vm5 = vcmp.lt.u32.totalorder %v173_v61, 3865470566  ;;  %747 = vst [vmem:[#allocation8 + $0x98] sm:$0xff] %v651_v59  ;;  %v652_v2 = vadd.f32 %v556_v58, %v460_v63  ;;  %v366_v4 = vmul.f32 1.1111112, %v78_v1 }
  0x59   :  { %v558_v5 = vld [vmem:[#allocation5 + $0xb0] sm:$0xff]  ;;  %v461_v7 = vsel %vm269_vm5, %v365_v0, 0.0  ;;  %vm270_vm6 = vcmp.lt.u32.totalorder %v174_v3, 3865470566  ;;  %v175_v8 = vld [vmem:[#allocation7 + $0xb8] sm:$0xff]  ;;  %v80_v13 = vld [vmem:[#allocation2 + $0xc0] sm:$0xff] }
  0x5a   :  { %v367_v9 = vmul.f32 1.1111112, %v79_v6  ;;  %748 = vst [vmem:[#allocation8 + $0xa0] sm:$0xff] %v652_v2  ;;  %v653_v10 = vadd.f32 %v557_v62, %v461_v7  ;;  %v462_v11 = vsel %vm270_vm6, %v366_v4, 0.0  ;;  %vm271_vm7 = vcmp.lt.u32.totalorder %v175_v8, 3865470566 }
  0x5b   :  { %v559_v12 = vld [vmem:[#allocation5 + $0xb8] sm:$0xff]  ;;  %v176_v14 = vld [vmem:[#allocation7 + $0xc0] sm:$0xff]  ;;  %v654_v15 = vadd.f32 %v558_v5, %v462_v11  ;;  %v368_v17 = vmul.f32 1.1111112, %v80_v13  ;;  %v81_v20 = vld [vmem:[#allocation2 + $0xc8] sm:$0xff] }
  0x5c   :  { %v463_v16 = vsel %vm271_vm7, %v367_v9, 0.0  ;;  %vm272_vm8 = vcmp.lt.u32.totalorder %v176_v14, 3865470566  ;;  %v560_v18 = vld [vmem:[#allocation5 + $0xc0] sm:$0xff]  ;;  %749 = vst [vmem:[#allocation8 + $0xa8] sm:$0xff] %v653_v10  ;;  %v177_v21 = vld [vmem:[#allocation7 + $0xc8] sm:$0xff] }
  0x5d   :  { %v655_v19 = vadd.f32 %v559_v12, %v463_v16  ;;  %v561_v22 = vld [vmem:[#allocation5 + $0xc8] sm:$0xff]  ;;  %750 = vst [vmem:[#allocation8 + $0xb0] sm:$0xff] %v654_v15  ;;  %v464_v23 = vsel %vm272_vm8, %v368_v17, 0.0  ;;  %vm273_vm9 = vcmp.lt.u32.totalorder %v177_v21, 3865470566  ;;  %v82_v25 = vld [vmem:[#allocation2 + $0xd0] sm:$0xff] }
  0x5e   :  { %v369_v24 = vmul.f32 1.1111112, %v81_v20  ;;  %v656_v26 = vadd.f32 %v560_v18, %v464_v23  ;;  %v178_v27 = vld [vmem:[#allocation7 + $0xd0] sm:$0xff]  ;;  %v370_v28 = vmul.f32 1.1111112, %v82_v25  ;;  %v83_v30 = vld [vmem:[#allocation2 + $0xd8] sm:$0xff] }
  0x5f   :  { %751 = vst [vmem:[#allocation8 + $0xb8] sm:$0xff] %v655_v19  ;;  %v562_v29 = vld [vmem:[#allocation5 + $0xd0] sm:$0xff]  ;;  %vm274_vm10 = vcmp.lt.u32.totalorder %v178_v27, 3865470566  ;;  %v179_v32 = vld [vmem:[#allocation7 + $0xd8] sm:$0xff]  ;;  %v84_v37 = vld [vmem:[#allocation2 + $0xe0] sm:$0xff] }
  0x60   :  { %v465_v31 = vsel %vm273_vm9, %v369_v24, 0.0  ;;  %v371_v33 = vmul.f32 1.1111112, %v83_v30  ;;  %752 = vst [vmem:[#allocation8 + $0xc0] sm:$0xff] %v656_v26  ;;  %v466_v35 = vsel %vm274_vm10, %v370_v28, 0.0  ;;  %v563_v36 = vld [vmem:[#allocation5 + $0xd8] sm:$0xff] }
  0x61   :  { %v657_v34 = vadd.f32 %v561_v22, %v465_v31  ;;  %vm275_vm11 = vcmp.lt.u32.totalorder %v179_v32, 3865470566  ;;  %v180_v38 = vld [vmem:[#allocation7 + $0xe0] sm:$0xff]  ;;  %v658_v39 = vadd.f32 %v562_v29, %v466_v35  ;;  %v372_v41 = vmul.f32 1.1111112, %v84_v37  ;;  %v85_v44 = vld [vmem:[#allocation2 + $0xe8] sm:$0xff] }
  0x62   :  { %v467_v40 = vsel %vm275_vm11, %v371_v33, 0.0  ;;  %vm276_vm12 = vcmp.lt.u32.totalorder %v180_v38, 3865470566  ;;  %v564_v42 = vld [vmem:[#allocation5 + $0xe0] sm:$0xff]  ;;  %v181_v45 = vld [vmem:[#allocation7 + $0xe8] sm:$0xff]  ;;  %v86_v49 = vld [vmem:[#allocation2 + $0xf0] sm:$0xff] }
  0x63   :  { %753 = vst [vmem:[#allocation8 + $0xc8] sm:$0xff] %v657_v34  ;;  %v659_v43 = vadd.f32 %v563_v36, %v467_v40  ;;  %v565_v46 = vld [vmem:[#allocation5 + $0xe8] sm:$0xff]  ;;  %754 = vst [vmem:[#allocation8 + $0xd0] sm:$0xff] %v658_v39  ;;  %v468_v47 = vsel %vm276_vm12, %v372_v41, 0.0  ;;  %vm277_vm13 = vcmp.lt.u32.totalorder %v181_v45, 3865470566 }
  0x64   :  { %v373_v48 = vmul.f32 1.1111112, %v85_v44  ;;  %v660_v50 = vadd.f32 %v564_v42, %v468_v47  ;;  %v182_v51 = vld [vmem:[#allocation7 + $0xf0] sm:$0xff]  ;;  %v374_v52 = vmul.f32 1.1111112, %v86_v49  ;;  %v87_v54 = vld [vmem:[#allocation2 + $0xf8] sm:$0xff] }
  0x65   :  { %755 = vst [vmem:[#allocation8 + $0xd8] sm:$0xff] %v659_v43  ;;  %v566_v53 = vld [vmem:[#allocation5 + $0xf0] sm:$0xff]  ;;  %vm278_vm14 = vcmp.lt.u32.totalorder %v182_v51, 3865470566  ;;  %v183_v56 = vld [vmem:[#allocation7 + $0xf8] sm:$0xff]  ;;  %v88_v61 = vld [vmem:[#allocation2 + $0x100] sm:$0xff] }
  0x66   :  { %v469_v55 = vsel %vm277_vm13, %v373_v48, 0.0  ;;  %v375_v57 = vmul.f32 1.1111112, %v87_v54  ;;  %756 = vst [vmem:[#allocation8 + $0xe0] sm:$0xff] %v660_v50  ;;  %v470_v59 = vsel %vm278_vm14, %v374_v52, 0.0  ;;  %v567_v60 = vld [vmem:[#allocation5 + $0xf8] sm:$0xff] }
  0x67   :  { %v661_v58 = vadd.f32 %v565_v46, %v469_v55  ;;  %vm279_vm15 = vcmp.lt.u32.totalorder %v183_v56, 3865470566  ;;  %v184_v62 = vld [vmem:[#allocation7 + $0x100] sm:$0xff]  ;;  %v662_v63 = vadd.f32 %v566_v53, %v470_v59  ;;  %v376_v1 = vmul.f32 1.1111112, %v88_v61  ;;  %v89_v4 = vld [vmem:[#allocation2 + $0x108] sm:$0xff] }
  0x68   :  { %v471_v0 = vsel %vm279_vm15, %v375_v57, 0.0  ;;  %vm280_vm0 = vcmp.lt.u32.totalorder %v184_v62, 3865470566  ;;  %v568_v2 = vld [vmem:[#allocation5 + $0x100] sm:$0xff]  ;;  %v185_v5 = vld [vmem:[#allocation7 + $0x108] sm:$0xff]  ;;  %v90_v9 = vld [vmem:[#allocation2 + $0x110] sm:$0xff] }
  0x69   :  { %757 = vst [vmem:[#allocation8 + $0xe8] sm:$0xff] %v661_v58  ;;  %v663_v3 = vadd.f32 %v567_v60, %v471_v0  ;;  %v569_v6 = vld [vmem:[#allocation5 + $0x108] sm:$0xff]  ;;  %758 = vst [vmem:[#allocation8 + $0xf0] sm:$0xff] %v662_v63  ;;  %v472_v7 = vsel %vm280_vm0, %v376_v1, 0.0  ;;  %vm281_vm1 = vcmp.lt.u32.totalorder %v185_v5, 3865470566 }
  0x6a   :  { %v377_v8 = vmul.f32 1.1111112, %v89_v4  ;;  %v664_v10 = vadd.f32 %v568_v2, %v472_v7  ;;  %v186_v11 = vld [vmem:[#allocation7 + $0x110] sm:$0xff]  ;;  %v378_v12 = vmul.f32 1.1111112, %v90_v9  ;;  %v91_v14 = vld [vmem:[#allocation2 + $0x118] sm:$0xff] }
  0x6b   :  { %759 = vst [vmem:[#allocation8 + $0xf8] sm:$0xff] %v663_v3  ;;  %v570_v13 = vld [vmem:[#allocation5 + $0x110] sm:$0xff]  ;;  %vm282_vm2 = vcmp.lt.u32.totalorder %v186_v11, 3865470566  ;;  %v187_v16 = vld [vmem:[#allocation7 + $0x118] sm:$0xff]  ;;  %v92_v21 = vld [vmem:[#allocation2 + $0x120] sm:$0xff] }
  0x6c   :  { %v473_v15 = vsel %vm281_vm1, %v377_v8, 0.0  ;;  %v379_v17 = vmul.f32 1.1111112, %v91_v14  ;;  %760 = vst [vmem:[#allocation8 + $0x100] sm:$0xff] %v664_v10  ;;  %v474_v19 = vsel %vm282_vm2, %v378_v12, 0.0  ;;  %v571_v20 = vld [vmem:[#allocation5 + $0x118] sm:$0xff] }
  0x6d   :  { %v665_v18 = vadd.f32 %v569_v6, %v473_v15  ;;  %vm283_vm3 = vcmp.lt.u32.totalorder %v187_v16, 3865470566  ;;  %v188_v22 = vld [vmem:[#allocation7 + $0x120] sm:$0xff]  ;;  %v666_v23 = vadd.f32 %v570_v13, %v474_v19  ;;  %v380_v25 = vmul.f32 1.1111112, %v92_v21  ;;  %v93_v28 = vld [vmem:[#allocation2 + $0x128] sm:$0xff] }
  0x6e   :  { %v475_v24 = vsel %vm283_vm3, %v379_v17, 0.0  ;;  %vm284_vm4 = vcmp.lt.u32.totalorder %v188_v22, 3865470566  ;;  %v572_v26 = vld [vmem:[#allocation5 + $0x120] sm:$0xff]  ;;  %v189_v29 = vld [vmem:[#allocation7 + $0x128] sm:$0xff]  ;;  %v94_v33 = vld [vmem:[#allocation2 + $0x130] sm:$0xff] }
  0x6f   :  { %761 = vst [vmem:[#allocation8 + $0x108] sm:$0xff] %v665_v18  ;;  %v667_v27 = vadd.f32 %v571_v20, %v475_v24  ;;  %v573_v30 = vld [vmem:[#allocation5 + $0x128] sm:$0xff]  ;;  %762 = vst [vmem:[#allocation8 + $0x110] sm:$0xff] %v666_v23  ;;  %v476_v31 = vsel %vm284_vm4, %v380_v25, 0.0  ;;  %vm285_vm5 = vcmp.lt.u32.totalorder %v189_v29, 3865470566 }
  0x70   :  { %v381_v32 = vmul.f32 1.1111112, %v93_v28  ;;  %v668_v34 = vadd.f32 %v572_v26, %v476_v31  ;;  %v190_v35 = vld [vmem:[#allocation7 + $0x130] sm:$0xff]  ;;  %v382_v36 = vmul.f32 1.1111112, %v94_v33  ;;  %v95_v38 = vld [vmem:[#allocation2 + $0x138] sm:$0xff] }
  0x71   :  { %763 = vst [vmem:[#allocation8 + $0x118] sm:$0xff] %v667_v27  ;;  %v574_v37 = vld [vmem:[#allocation5 + $0x130] sm:$0xff]  ;;  %vm286_vm6 = vcmp.lt.u32.totalorder %v190_v35, 3865470566  ;;  %v191_v40 = vld [vmem:[#allocation7 + $0x138] sm:$0xff]  ;;  %v96_v45 = vld [vmem:[#allocation2 + $0x140] sm:$0xff] }
  0x72   :  { %v477_v39 = vsel %vm285_vm5, %v381_v32, 0.0  ;;  %v383_v41 = vmul.f32 1.1111112, %v95_v38  ;;  %764 = vst [vmem:[#allocation8 + $0x120] sm:$0xff] %v668_v34  ;;  %v478_v43 = vsel %vm286_vm6, %v382_v36, 0.0  ;;  %v575_v44 = vld [vmem:[#allocation5 + $0x138] sm:$0xff] }
  0x73   :  { %v669_v42 = vadd.f32 %v573_v30, %v477_v39  ;;  %vm287_vm7 = vcmp.lt.u32.totalorder %v191_v40, 3865470566  ;;  %v192_v46 = vld [vmem:[#allocation7 + $0x140] sm:$0xff]  ;;  %v670_v47 = vadd.f32 %v574_v37, %v478_v43  ;;  %v384_v49 = vmul.f32 1.1111112, %v96_v45  ;;  %v97_v52 = vld [vmem:[#allocation2 + $0x148] sm:$0xff] }
  0x74   :  { %v479_v48 = vsel %vm287_vm7, %v383_v41, 0.0  ;;  %vm288_vm8 = vcmp.lt.u32.totalorder %v192_v46, 3865470566  ;;  %v576_v50 = vld [vmem:[#allocation5 + $0x140] sm:$0xff]  ;;  %v193_v53 = vld [vmem:[#allocation7 + $0x148] sm:$0xff]  ;;  %v98_v57 = vld [vmem:[#allocation2 + $0x150] sm:$0xff] }
  0x75   :  { %765 = vst [vmem:[#allocation8 + $0x128] sm:$0xff] %v669_v42  ;;  %v671_v51 = vadd.f32 %v575_v44, %v479_v48  ;;  %v577_v54 = vld [vmem:[#allocation5 + $0x148] sm:$0xff]  ;;  %766 = vst [vmem:[#allocation8 + $0x130] sm:$0xff] %v670_v47  ;;  %v480_v55 = vsel %vm288_vm8, %v384_v49, 0.0  ;;  %vm289_vm9 = vcmp.lt.u32.totalorder %v193_v53, 3865470566 }
  0x76   :  { %v385_v56 = vmul.f32 1.1111112, %v97_v52  ;;  %v672_v58 = vadd.f32 %v576_v50, %v480_v55  ;;  %v194_v59 = vld [vmem:[#allocation7 + $0x150] sm:$0xff]  ;;  %v386_v60 = vmul.f32 1.1111112, %v98_v57  ;;  %v99_v62 = vld [vmem:[#allocation2 + $0x158] sm:$0xff] }
  0x77   :  { %767 = vst [vmem:[#allocation8 + $0x138] sm:$0xff] %v671_v51  ;;  %v578_v61 = vld [vmem:[#allocation5 + $0x150] sm:$0xff]  ;;  %vm290_vm10 = vcmp.lt.u32.totalorder %v194_v59, 3865470566  ;;  %v195_v0 = vld [vmem:[#allocation7 + $0x158] sm:$0xff]  ;;  %v100_v5 = vld [vmem:[#allocation2 + $0x160] sm:$0xff] }
  0x78   :  { %v481_v63 = vsel %vm289_vm9, %v385_v56, 0.0  ;;  %v387_v1 = vmul.f32 1.1111112, %v99_v62  ;;  %768 = vst [vmem:[#allocation8 + $0x140] sm:$0xff] %v672_v58  ;;  %v482_v3 = vsel %vm290_vm10, %v386_v60, 0.0  ;;  %v579_v4 = vld [vmem:[#allocation5 + $0x158] sm:$0xff] }
  0x79   :  { %v673_v2 = vadd.f32 %v577_v54, %v481_v63  ;;  %vm291_vm11 = vcmp.lt.u32.totalorder %v195_v0, 3865470566  ;;  %v196_v6 = vld [vmem:[#allocation7 + $0x160] sm:$0xff]  ;;  %v674_v7 = vadd.f32 %v578_v61, %v482_v3  ;;  %v388_v9 = vmul.f32 1.1111112, %v100_v5  ;;  %v101_v12 = vld [vmem:[#allocation2 + $0x168] sm:$0xff] }
  0x7a   :  { %v483_v8 = vsel %vm291_vm11, %v387_v1, 0.0  ;;  %vm292_vm12 = vcmp.lt.u32.totalorder %v196_v6, 3865470566  ;;  %v580_v10 = vld [vmem:[#allocation5 + $0x160] sm:$0xff]  ;;  %v197_v13 = vld [vmem:[#allocation7 + $0x168] sm:$0xff]  ;;  %v102_v17 = vld [vmem:[#allocation2 + $0x170] sm:$0xff] }
  0x7b   :  { %769 = vst [vmem:[#allocation8 + $0x148] sm:$0xff] %v673_v2  ;;  %v675_v11 = vadd.f32 %v579_v4, %v483_v8  ;;  %v581_v14 = vld [vmem:[#allocation5 + $0x168] sm:$0xff]  ;;  %770 = vst [vmem:[#allocation8 + $0x150] sm:$0xff] %v674_v7  ;;  %v484_v15 = vsel %vm292_vm12, %v388_v9, 0.0  ;;  %vm293_vm13 = vcmp.lt.u32.totalorder %v197_v13, 3865470566 }
  0x7c   :  { %v389_v16 = vmul.f32 1.1111112, %v101_v12  ;;  %v676_v18 = vadd.f32 %v580_v10, %v484_v15  ;;  %v198_v19 = vld [vmem:[#allocation7 + $0x170] sm:$0xff]  ;;  %v390_v20 = vmul.f32 1.1111112, %v102_v17  ;;  %v103_v22 = vld [vmem:[#allocation2 + $0x178] sm:$0xff] }
  0x7d   :  { %771 = vst [vmem:[#allocation8 + $0x158] sm:$0xff] %v675_v11  ;;  %v582_v21 = vld [vmem:[#allocation5 + $0x170] sm:$0xff]  ;;  %vm294_vm14 = vcmp.lt.u32.totalorder %v198_v19, 3865470566  ;;  %v199_v24 = vld [vmem:[#allocation7 + $0x178] sm:$0xff]  ;;  %v104_v29 = vld [vmem:[#allocation2 + $0x180] sm:$0xff] }
  0x7e   :  { %v485_v23 = vsel %vm293_vm13, %v389_v16, 0.0  ;;  %v391_v25 = vmul.f32 1.1111112, %v103_v22  ;;  %772 = vst [vmem:[#allocation8 + $0x160] sm:$0xff] %v676_v18  ;;  %v486_v27 = vsel %vm294_vm14, %v390_v20, 0.0  ;;  %v583_v28 = vld [vmem:[#allocation5 + $0x178] sm:$0xff] }
  0x7f   :  { %v677_v26 = vadd.f32 %v581_v14, %v485_v23  ;;  %vm295_vm15 = vcmp.lt.u32.totalorder %v199_v24, 3865470566  ;;  %v200_v30 = vld [vmem:[#allocation7 + $0x180] sm:$0xff]  ;;  %v678_v31 = vadd.f32 %v582_v21, %v486_v27  ;;  %v392_v33 = vmul.f32 1.1111112, %v104_v29  ;;  %v105_v36 = vld [vmem:[#allocation2 + $0x188] sm:$0xff] }
  0x80   :  { %v487_v32 = vsel %vm295_vm15, %v391_v25, 0.0  ;;  %vm296_vm0 = vcmp.lt.u32.totalorder %v200_v30, 3865470566  ;;  %v584_v34 = vld [vmem:[#allocation5 + $0x180] sm:$0xff]  ;;  %v201_v37 = vld [vmem:[#allocation7 + $0x188] sm:$0xff]  ;;  %v106_v41 = vld [vmem:[#allocation2 + $0x190] sm:$0xff] }
  0x81   :  { %773 = vst [vmem:[#allocation8 + $0x168] sm:$0xff] %v677_v26  ;;  %v679_v35 = vadd.f32 %v583_v28, %v487_v32  ;;  %v585_v38 = vld [vmem:[#allocation5 + $0x188] sm:$0xff]  ;;  %774 = vst [vmem:[#allocation8 + $0x170] sm:$0xff] %v678_v31  ;;  %v488_v39 = vsel %vm296_vm0, %v392_v33, 0.0  ;;  %vm297_vm1 = vcmp.lt.u32.totalorder %v201_v37, 3865470566 }
  0x82   :  { %v393_v40 = vmul.f32 1.1111112, %v105_v36  ;;  %v680_v42 = vadd.f32 %v584_v34, %v488_v39  ;;  %v202_v43 = vld [vmem:[#allocation7 + $0x190] sm:$0xff]  ;;  %v394_v44 = vmul.f32 1.1111112, %v106_v41  ;;  %v107_v46 = vld [vmem:[#allocation2 + $0x198] sm:$0xff] }
  0x83   :  { %775 = vst [vmem:[#allocation8 + $0x178] sm:$0xff] %v679_v35  ;;  %v586_v45 = vld [vmem:[#allocation5 + $0x190] sm:$0xff]  ;;  %vm298_vm2 = vcmp.lt.u32.totalorder %v202_v43, 3865470566  ;;  %v203_v48 = vld [vmem:[#allocation7 + $0x198] sm:$0xff]  ;;  %v108_v53 = vld [vmem:[#allocation2 + $0x1a0] sm:$0xff] }
  0x84   :  { %v489_v47 = vsel %vm297_vm1, %v393_v40, 0.0  ;;  %v395_v49 = vmul.f32 1.1111112, %v107_v46  ;;  %776 = vst [vmem:[#allocation8 + $0x180] sm:$0xff] %v680_v42  ;;  %v490_v51 = vsel %vm298_vm2, %v394_v44, 0.0  ;;  %v587_v52 = vld [vmem:[#allocation5 + $0x198] sm:$0xff] }
  0x85   :  { %v681_v50 = vadd.f32 %v585_v38, %v489_v47  ;;  %vm299_vm3 = vcmp.lt.u32.totalorder %v203_v48, 3865470566  ;;  %v204_v54 = vld [vmem:[#allocation7 + $0x1a0] sm:$0xff]  ;;  %v682_v55 = vadd.f32 %v586_v45, %v490_v51  ;;  %v396_v57 = vmul.f32 1.1111112, %v108_v53  ;;  %v109_v60 = vld [vmem:[#allocation2 + $0x1a8] sm:$0xff] }
  0x86   :  { %v491_v56 = vsel %vm299_vm3, %v395_v49, 0.0  ;;  %vm300_vm4 = vcmp.lt.u32.totalorder %v204_v54, 3865470566  ;;  %v588_v58 = vld [vmem:[#allocation5 + $0x1a0] sm:$0xff]  ;;  %v205_v61 = vld [vmem:[#allocation7 + $0x1a8] sm:$0xff]  ;;  %v110_v1 = vld [vmem:[#allocation2 + $0x1b0] sm:$0xff] }
  0x87   :  { %777 = vst [vmem:[#allocation8 + $0x188] sm:$0xff] %v681_v50  ;;  %v683_v59 = vadd.f32 %v587_v52, %v491_v56  ;;  %v589_v62 = vld [vmem:[#allocation5 + $0x1a8] sm:$0xff]  ;;  %778 = vst [vmem:[#allocation8 + $0x190] sm:$0xff] %v682_v55  ;;  %v492_v63 = vsel %vm300_vm4, %v396_v57, 0.0  ;;  %vm301_vm5 = vcmp.lt.u32.totalorder %v205_v61, 3865470566 }
  0x88   :  { %v397_v0 = vmul.f32 1.1111112, %v109_v60  ;;  %v684_v2 = vadd.f32 %v588_v58, %v492_v63  ;;  %v206_v3 = vld [vmem:[#allocation7 + $0x1b0] sm:$0xff]  ;;  %v398_v4 = vmul.f32 1.1111112, %v110_v1  ;;  %v111_v6 = vld [vmem:[#allocation2 + $0x1b8] sm:$0xff] }
  0x89   :  { %779 = vst [vmem:[#allocation8 + $0x198] sm:$0xff] %v683_v59  ;;  %v590_v5 = vld [vmem:[#allocation5 + $0x1b0] sm:$0xff]  ;;  %vm302_vm6 = vcmp.lt.u32.totalorder %v206_v3, 3865470566  ;;  %v207_v8 = vld [vmem:[#allocation7 + $0x1b8] sm:$0xff]  ;;  %v112_v13 = vld [vmem:[#allocation2 + $0x1c0] sm:$0xff] }
  0x8a   :  { %v493_v7 = vsel %vm301_vm5, %v397_v0, 0.0  ;;  %v399_v9 = vmul.f32 1.1111112, %v111_v6  ;;  %780 = vst [vmem:[#allocation8 + $0x1a0] sm:$0xff] %v684_v2  ;;  %v494_v11 = vsel %vm302_vm6, %v398_v4, 0.0  ;;  %v591_v12 = vld [vmem:[#allocation5 + $0x1b8] sm:$0xff] }
  0x8b   :  { %v685_v10 = vadd.f32 %v589_v62, %v493_v7  ;;  %vm303_vm7 = vcmp.lt.u32.totalorder %v207_v8, 3865470566  ;;  %v208_v14 = vld [vmem:[#allocation7 + $0x1c0] sm:$0xff]  ;;  %v686_v15 = vadd.f32 %v590_v5, %v494_v11  ;;  %v400_v17 = vmul.f32 1.1111112, %v112_v13  ;;  %v113_v20 = vld [vmem:[#allocation2 + $0x1c8] sm:$0xff] }
  0x8c   :  { %v495_v16 = vsel %vm303_vm7, %v399_v9, 0.0  ;;  %vm304_vm8 = vcmp.lt.u32.totalorder %v208_v14, 3865470566  ;;  %v592_v18 = vld [vmem:[#allocation5 + $0x1c0] sm:$0xff]  ;;  %v209_v21 = vld [vmem:[#allocation7 + $0x1c8] sm:$0xff]  ;;  %v114_v25 = vld [vmem:[#allocation2 + $0x1d0] sm:$0xff] }
  0x8d   :  { %781 = vst [vmem:[#allocation8 + $0x1a8] sm:$0xff] %v685_v10  ;;  %v687_v19 = vadd.f32 %v591_v12, %v495_v16  ;;  %v593_v22 = vld [vmem:[#allocation5 + $0x1c8] sm:$0xff]  ;;  %782 = vst [vmem:[#allocation8 + $0x1b0] sm:$0xff] %v686_v15  ;;  %v496_v23 = vsel %vm304_vm8, %v400_v17, 0.0  ;;  %vm305_vm9 = vcmp.lt.u32.totalorder %v209_v21, 3865470566 }
  0x8e   :  { %v401_v24 = vmul.f32 1.1111112, %v113_v20  ;;  %v688_v26 = vadd.f32 %v592_v18, %v496_v23  ;;  %v210_v27 = vld [vmem:[#allocation7 + $0x1d0] sm:$0xff]  ;;  %v402_v28 = vmul.f32 1.1111112, %v114_v25  ;;  %v115_v30 = vld [vmem:[#allocation2 + $0x1d8] sm:$0xff] }
  0x8f   :  { %783 = vst [vmem:[#allocation8 + $0x1b8] sm:$0xff] %v687_v19  ;;  %v594_v29 = vld [vmem:[#allocation5 + $0x1d0] sm:$0xff]  ;;  %vm306_vm10 = vcmp.lt.u32.totalorder %v210_v27, 3865470566  ;;  %v211_v32 = vld [vmem:[#allocation7 + $0x1d8] sm:$0xff]  ;;  %v116_v37 = vld [vmem:[#allocation2 + $0x1e0] sm:$0xff] }
  0x90   :  { %v497_v31 = vsel %vm305_vm9, %v401_v24, 0.0  ;;  %v403_v33 = vmul.f32 1.1111112, %v115_v30  ;;  %784 = vst [vmem:[#allocation8 + $0x1c0] sm:$0xff] %v688_v26  ;;  %v498_v35 = vsel %vm306_vm10, %v402_v28, 0.0  ;;  %v595_v36 = vld [vmem:[#allocation5 + $0x1d8] sm:$0xff] }
  0x91   :  { %v689_v34 = vadd.f32 %v593_v22, %v497_v31  ;;  %vm307_vm11 = vcmp.lt.u32.totalorder %v211_v32, 3865470566  ;;  %v212_v38 = vld [vmem:[#allocation7 + $0x1e0] sm:$0xff]  ;;  %v690_v39 = vadd.f32 %v594_v29, %v498_v35  ;;  %v404_v41 = vmul.f32 1.1111112, %v116_v37  ;;  %v117_v44 = vld [vmem:[#allocation2 + $0x1e8] sm:$0xff] }
  0x92   :  { %v499_v40 = vsel %vm307_vm11, %v403_v33, 0.0  ;;  %vm308_vm12 = vcmp.lt.u32.totalorder %v212_v38, 3865470566  ;;  %v596_v42 = vld [vmem:[#allocation5 + $0x1e0] sm:$0xff]  ;;  %v213_v45 = vld [vmem:[#allocation7 + $0x1e8] sm:$0xff]  ;;  %v118_v49 = vld [vmem:[#allocation2 + $0x1f0] sm:$0xff] }
  0x93   :  { %785 = vst [vmem:[#allocation8 + $0x1c8] sm:$0xff] %v689_v34  ;;  %v691_v43 = vadd.f32 %v595_v36, %v499_v40  ;;  %v597_v46 = vld [vmem:[#allocation5 + $0x1e8] sm:$0xff]  ;;  %786 = vst [vmem:[#allocation8 + $0x1d0] sm:$0xff] %v690_v39  ;;  %v500_v47 = vsel %vm308_vm12, %v404_v41, 0.0  ;;  %vm309_vm13 = vcmp.lt.u32.totalorder %v213_v45, 3865470566 }
  0x94   :  { %v405_v48 = vmul.f32 1.1111112, %v117_v44  ;;  %v692_v50 = vadd.f32 %v596_v42, %v500_v47  ;;  %v214_v51 = vld [vmem:[#allocation7 + $0x1f0] sm:$0xff]  ;;  %v406_v52 = vmul.f32 1.1111112, %v118_v49  ;;  %v119_v54 = vld [vmem:[#allocation2 + $0x1f8] sm:$0xff] }
  0x95   :  { %787 = vst [vmem:[#allocation8 + $0x1d8] sm:$0xff] %v691_v43  ;;  %v598_v53 = vld [vmem:[#allocation5 + $0x1f0] sm:$0xff]  ;;  %vm310_vm14 = vcmp.lt.u32.totalorder %v214_v51, 3865470566  ;;  %v215_v56 = vld [vmem:[#allocation7 + $0x1f8] sm:$0xff]  ;;  %v120_v61 = vld [vmem:[#allocation2 + $0x200] sm:$0xff] }
  0x96   :  { %v501_v55 = vsel %vm309_vm13, %v405_v48, 0.0  ;;  %v407_v57 = vmul.f32 1.1111112, %v119_v54  ;;  %788 = vst [vmem:[#allocation8 + $0x1e0] sm:$0xff] %v692_v50  ;;  %v502_v59 = vsel %vm310_vm14, %v406_v52, 0.0  ;;  %v599_v60 = vld [vmem:[#allocation5 + $0x1f8] sm:$0xff] }
  0x97   :  { %v693_v58 = vadd.f32 %v597_v46, %v501_v55  ;;  %vm311_vm15 = vcmp.lt.u32.totalorder %v215_v56, 3865470566  ;;  %v216_v62 = vld [vmem:[#allocation7 + $0x200] sm:$0xff]  ;;  %v694_v63 = vadd.f32 %v598_v53, %v502_v59  ;;  %v408_v1 = vmul.f32 1.1111112, %v120_v61  ;;  %v121_v4 = vld [vmem:[#allocation2 + $0x208] sm:$0xff] }
  0x98   :  { %v503_v0 = vsel %vm311_vm15, %v407_v57, 0.0  ;;  %vm312_vm0 = vcmp.lt.u32.totalorder %v216_v62, 3865470566  ;;  %v600_v2 = vld [vmem:[#allocation5 + $0x200] sm:$0xff]  ;;  %v217_v5 = vld [vmem:[#allocation7 + $0x208] sm:$0xff]  ;;  %v122_v9 = vld [vmem:[#allocation2 + $0x210] sm:$0xff] }
  0x99   :  { %789 = vst [vmem:[#allocation8 + $0x1e8] sm:$0xff] %v693_v58  ;;  %v695_v3 = vadd.f32 %v599_v60, %v503_v0  ;;  %v601_v6 = vld [vmem:[#allocation5 + $0x208] sm:$0xff]  ;;  %790 = vst [vmem:[#allocation8 + $0x1f0] sm:$0xff] %v694_v63  ;;  %v504_v7 = vsel %vm312_vm0, %v408_v1, 0.0  ;;  %vm313_vm1 = vcmp.lt.u32.totalorder %v217_v5, 3865470566 }
  0x9a   :  { %v409_v8 = vmul.f32 1.1111112, %v121_v4  ;;  %v696_v10 = vadd.f32 %v600_v2, %v504_v7  ;;  %v218_v11 = vld [vmem:[#allocation7 + $0x210] sm:$0xff]  ;;  %v410_v12 = vmul.f32 1.1111112, %v122_v9  ;;  %v123_v14 = vld [vmem:[#allocation2 + $0x218] sm:$0xff] }
  0x9b   :  { %791 = vst [vmem:[#allocation8 + $0x1f8] sm:$0xff] %v695_v3  ;;  %v602_v13 = vld [vmem:[#allocation5 + $0x210] sm:$0xff]  ;;  %vm314_vm2 = vcmp.lt.u32.totalorder %v218_v11, 3865470566  ;;  %v219_v16 = vld [vmem:[#allocation7 + $0x218] sm:$0xff]  ;;  %v124_v21 = vld [vmem:[#allocation2 + $0x220] sm:$0xff] }
  0x9c   :  { %v505_v15 = vsel %vm313_vm1, %v409_v8, 0.0  ;;  %v411_v17 = vmul.f32 1.1111112, %v123_v14  ;;  %792 = vst [vmem:[#allocation8 + $0x200] sm:$0xff] %v696_v10  ;;  %v506_v19 = vsel %vm314_vm2, %v410_v12, 0.0  ;;  %v603_v20 = vld [vmem:[#allocation5 + $0x218] sm:$0xff] }
  0x9d   :  { %v697_v18 = vadd.f32 %v601_v6, %v505_v15  ;;  %vm315_vm3 = vcmp.lt.u32.totalorder %v219_v16, 3865470566  ;;  %v220_v22 = vld [vmem:[#allocation7 + $0x220] sm:$0xff]  ;;  %v698_v23 = vadd.f32 %v602_v13, %v506_v19  ;;  %v412_v25 = vmul.f32 1.1111112, %v124_v21  ;;  %v125_v28 = vld [vmem:[#allocation2 + $0x228] sm:$0xff] }
  0x9e   :  { %v507_v24 = vsel %vm315_vm3, %v411_v17, 0.0  ;;  %vm316_vm4 = vcmp.lt.u32.totalorder %v220_v22, 3865470566  ;;  %v604_v26 = vld [vmem:[#allocation5 + $0x220] sm:$0xff]  ;;  %v221_v29 = vld [vmem:[#allocation7 + $0x228] sm:$0xff]  ;;  %v126_v33 = vld [vmem:[#allocation2 + $0x230] sm:$0xff] }
  0x9f   :  { %793 = vst [vmem:[#allocation8 + $0x208] sm:$0xff] %v697_v18  ;;  %v699_v27 = vadd.f32 %v603_v20, %v507_v24  ;;  %v605_v30 = vld [vmem:[#allocation5 + $0x228] sm:$0xff]  ;;  %794 = vst [vmem:[#allocation8 + $0x210] sm:$0xff] %v698_v23  ;;  %v508_v31 = vsel %vm316_vm4, %v412_v25, 0.0  ;;  %vm317_vm5 = vcmp.lt.u32.totalorder %v221_v29, 3865470566 }
  0xa0   :  { %v413_v32 = vmul.f32 1.1111112, %v125_v28  ;;  %v700_v34 = vadd.f32 %v604_v26, %v508_v31  ;;  %v222_v35 = vld [vmem:[#allocation7 + $0x230] sm:$0xff]  ;;  %v414_v36 = vmul.f32 1.1111112, %v126_v33  ;;  %v127_v38 = vld [vmem:[#allocation2 + $0x238] sm:$0xff] }
  0xa1   :  { %795 = vst [vmem:[#allocation8 + $0x218] sm:$0xff] %v699_v27  ;;  %v606_v37 = vld [vmem:[#allocation5 + $0x230] sm:$0xff]  ;;  %vm318_vm6 = vcmp.lt.u32.totalorder %v222_v35, 3865470566  ;;  %v223_v40 = vld [vmem:[#allocation7 + $0x238] sm:$0xff]  ;;  %v128_v45 = vld [vmem:[#allocation2 + $0x240] sm:$0xff] }
  0xa2   :  { %v509_v39 = vsel %vm317_vm5, %v413_v32, 0.0  ;;  %v415_v41 = vmul.f32 1.1111112, %v127_v38  ;;  %796 = vst [vmem:[#allocation8 + $0x220] sm:$0xff] %v700_v34  ;;  %v510_v43 = vsel %vm318_vm6, %v414_v36, 0.0  ;;  %v607_v44 = vld [vmem:[#allocation5 + $0x238] sm:$0xff] }
  0xa3   :  { %v701_v42 = vadd.f32 %v605_v30, %v509_v39  ;;  %vm319_vm7 = vcmp.lt.u32.totalorder %v223_v40, 3865470566  ;;  %v224_v46 = vld [vmem:[#allocation7 + $0x240] sm:$0xff]  ;;  %v702_v47 = vadd.f32 %v606_v37, %v510_v43  ;;  %v416_v49 = vmul.f32 1.1111112, %v128_v45  ;;  %v129_v52 = vld [vmem:[#allocation2 + $0x248] sm:$0xff] }
  0xa4   :  { %v511_v48 = vsel %vm319_vm7, %v415_v41, 0.0  ;;  %vm320_vm8 = vcmp.lt.u32.totalorder %v224_v46, 3865470566  ;;  %v608_v50 = vld [vmem:[#allocation5 + $0x240] sm:$0xff]  ;;  %v225_v53 = vld [vmem:[#allocation7 + $0x248] sm:$0xff]  ;;  %v130_v57 = vld [vmem:[#allocation2 + $0x250] sm:$0xff] }
  0xa5   :  { %797 = vst [vmem:[#allocation8 + $0x228] sm:$0xff] %v701_v42  ;;  %v703_v51 = vadd.f32 %v607_v44, %v511_v48  ;;  %v609_v54 = vld [vmem:[#allocation5 + $0x248] sm:$0xff]  ;;  %798 = vst [vmem:[#allocation8 + $0x230] sm:$0xff] %v702_v47  ;;  %v512_v55 = vsel %vm320_vm8, %v416_v49, 0.0  ;;  %vm321_vm9 = vcmp.lt.u32.totalorder %v225_v53, 3865470566 }
  0xa6   :  { %v417_v56 = vmul.f32 1.1111112, %v129_v52  ;;  %v704_v58 = vadd.f32 %v608_v50, %v512_v55  ;;  %v226_v59 = vld [vmem:[#allocation7 + $0x250] sm:$0xff]  ;;  %v418_v60 = vmul.f32 1.1111112, %v130_v57  ;;  %v131_v62 = vld [vmem:[#allocation2 + $0x258] sm:$0xff] }
  0xa7   :  { %799 = vst [vmem:[#allocation8 + $0x238] sm:$0xff] %v703_v51  ;;  %v610_v61 = vld [vmem:[#allocation5 + $0x250] sm:$0xff]  ;;  %vm322_vm10 = vcmp.lt.u32.totalorder %v226_v59, 3865470566  ;;  %v227_v0 = vld [vmem:[#allocation7 + $0x258] sm:$0xff]  ;;  %v132_v5 = vld [vmem:[#allocation2 + $0x260] sm:$0xff] }
  0xa8   :  { %v513_v63 = vsel %vm321_vm9, %v417_v56, 0.0  ;;  %v419_v1 = vmul.f32 1.1111112, %v131_v62  ;;  %800 = vst [vmem:[#allocation8 + $0x240] sm:$0xff] %v704_v58  ;;  %v514_v3 = vsel %vm322_vm10, %v418_v60, 0.0  ;;  %v611_v4 = vld [vmem:[#allocation5 + $0x258] sm:$0xff] }
  0xa9   :  { %v705_v2 = vadd.f32 %v609_v54, %v513_v63  ;;  %vm323_vm11 = vcmp.lt.u32.totalorder %v227_v0, 3865470566  ;;  %v228_v6 = vld [vmem:[#allocation7 + $0x260] sm:$0xff]  ;;  %v706_v7 = vadd.f32 %v610_v61, %v514_v3  ;;  %v420_v9 = vmul.f32 1.1111112, %v132_v5  ;;  %v133_v12 = vld [vmem:[#allocation2 + $0x268] sm:$0xff] }
  0xaa   :  { %v515_v8 = vsel %vm323_vm11, %v419_v1, 0.0  ;;  %vm324_vm12 = vcmp.lt.u32.totalorder %v228_v6, 3865470566  ;;  %v612_v10 = vld [vmem:[#allocation5 + $0x260] sm:$0xff]  ;;  %v229_v13 = vld [vmem:[#allocation7 + $0x268] sm:$0xff]  ;;  %v134_v17 = vld [vmem:[#allocation2 + $0x270] sm:$0xff] }
  0xab   :  { %801 = vst [vmem:[#allocation8 + $0x248] sm:$0xff] %v705_v2  ;;  %v707_v11 = vadd.f32 %v611_v4, %v515_v8  ;;  %v613_v14 = vld [vmem:[#allocation5 + $0x268] sm:$0xff]  ;;  %802 = vst [vmem:[#allocation8 + $0x250] sm:$0xff] %v706_v7  ;;  %v516_v15 = vsel %vm324_vm12, %v420_v9, 0.0  ;;  %vm325_vm13 = vcmp.lt.u32.totalorder %v229_v13, 3865470566 }
  0xac   :  { %v421_v16 = vmul.f32 1.1111112, %v133_v12  ;;  %v708_v18 = vadd.f32 %v612_v10, %v516_v15  ;;  %v230_v19 = vld [vmem:[#allocation7 + $0x270] sm:$0xff]  ;;  %v422_v20 = vmul.f32 1.1111112, %v134_v17  ;;  %v135_v22 = vld [vmem:[#allocation2 + $0x278] sm:$0xff] }
  0xad   :  { %803 = vst [vmem:[#allocation8 + $0x258] sm:$0xff] %v707_v11  ;;  %v614_v21 = vld [vmem:[#allocation5 + $0x270] sm:$0xff]  ;;  %vm326_vm14 = vcmp.lt.u32.totalorder %v230_v19, 3865470566  ;;  %v231_v24 = vld [vmem:[#allocation7 + $0x278] sm:$0xff]  ;;  %v136_v29 = vld [vmem:[#allocation2 + $0x280] sm:$0xff] }
  0xae   :  { %v517_v23 = vsel %vm325_vm13, %v421_v16, 0.0  ;;  %v423_v25 = vmul.f32 1.1111112, %v135_v22  ;;  %804 = vst [vmem:[#allocation8 + $0x260] sm:$0xff] %v708_v18  ;;  %v518_v27 = vsel %vm326_vm14, %v422_v20, 0.0  ;;  %v615_v28 = vld [vmem:[#allocation5 + $0x278] sm:$0xff] }
  0xaf   :  { %v709_v26 = vadd.f32 %v613_v14, %v517_v23  ;;  %vm327_vm15 = vcmp.lt.u32.totalorder %v231_v24, 3865470566  ;;  %v232_v30 = vld [vmem:[#allocation7 + $0x280] sm:$0xff]  ;;  %v710_v31 = vadd.f32 %v614_v21, %v518_v27  ;;  %v424_v33 = vmul.f32 1.1111112, %v136_v29  ;;  %v137_v36 = vld [vmem:[#allocation2 + $0x288] sm:$0xff] }
  0xb0   :  { %v519_v32 = vsel %vm327_vm15, %v423_v25, 0.0  ;;  %vm328_vm0 = vcmp.lt.u32.totalorder %v232_v30, 3865470566  ;;  %v616_v34 = vld [vmem:[#allocation5 + $0x280] sm:$0xff]  ;;  %v233_v37 = vld [vmem:[#allocation7 + $0x288] sm:$0xff]  ;;  %v138_v41 = vld [vmem:[#allocation2 + $0x290] sm:$0xff] }
  0xb1   :  { %805 = vst [vmem:[#allocation8 + $0x268] sm:$0xff] %v709_v26  ;;  %v711_v35 = vadd.f32 %v615_v28, %v519_v32  ;;  %v617_v38 = vld [vmem:[#allocation5 + $0x288] sm:$0xff]  ;;  %806 = vst [vmem:[#allocation8 + $0x270] sm:$0xff] %v710_v31  ;;  %v520_v39 = vsel %vm328_vm0, %v424_v33, 0.0  ;;  %vm329_vm1 = vcmp.lt.u32.totalorder %v233_v37, 3865470566 }
  0xb2   :  { %v425_v40 = vmul.f32 1.1111112, %v137_v36  ;;  %v712_v42 = vadd.f32 %v616_v34, %v520_v39  ;;  %v234_v43 = vld [vmem:[#allocation7 + $0x290] sm:$0xff]  ;;  %v426_v44 = vmul.f32 1.1111112, %v138_v41  ;;  %v139_v46 = vld [vmem:[#allocation2 + $0x298] sm:$0xff] }
  0xb3   :  { %807 = vst [vmem:[#allocation8 + $0x278] sm:$0xff] %v711_v35  ;;  %v618_v45 = vld [vmem:[#allocation5 + $0x290] sm:$0xff]  ;;  %vm330_vm2 = vcmp.lt.u32.totalorder %v234_v43, 3865470566  ;;  %v235_v48 = vld [vmem:[#allocation7 + $0x298] sm:$0xff]  ;;  %v140_v53 = vld [vmem:[#allocation2 + $0x2a0] sm:$0xff] }
  0xb4   :  { %v521_v47 = vsel %vm329_vm1, %v425_v40, 0.0  ;;  %v427_v49 = vmul.f32 1.1111112, %v139_v46  ;;  %808 = vst [vmem:[#allocation8 + $0x280] sm:$0xff] %v712_v42  ;;  %v522_v51 = vsel %vm330_vm2, %v426_v44, 0.0  ;;  %v619_v52 = vld [vmem:[#allocation5 + $0x298] sm:$0xff] }
  0xb5   :  { %v713_v50 = vadd.f32 %v617_v38, %v521_v47  ;;  %vm331_vm3 = vcmp.lt.u32.totalorder %v235_v48, 3865470566  ;;  %v236_v54 = vld [vmem:[#allocation7 + $0x2a0] sm:$0xff]  ;;  %v714_v55 = vadd.f32 %v618_v45, %v522_v51  ;;  %v428_v57 = vmul.f32 1.1111112, %v140_v53  ;;  %v141_v60 = vld [vmem:[#allocation2 + $0x2a8] sm:$0xff] }
  0xb6   :  { %v523_v56 = vsel %vm331_vm3, %v427_v49, 0.0  ;;  %vm332_vm4 = vcmp.lt.u32.totalorder %v236_v54, 3865470566  ;;  %v620_v58 = vld [vmem:[#allocation5 + $0x2a0] sm:$0xff]  ;;  %v237_v61 = vld [vmem:[#allocation7 + $0x2a8] sm:$0xff]  ;;  %v142_v1 = vld [vmem:[#allocation2 + $0x2b0] sm:$0xff] }
  0xb7   :  { %809 = vst [vmem:[#allocation8 + $0x288] sm:$0xff] %v713_v50  ;;  %v715_v59 = vadd.f32 %v619_v52, %v523_v56  ;;  %v621_v62 = vld [vmem:[#allocation5 + $0x2a8] sm:$0xff]  ;;  %810 = vst [vmem:[#allocation8 + $0x290] sm:$0xff] %v714_v55  ;;  %v524_v63 = vsel %vm332_vm4, %v428_v57, 0.0  ;;  %vm333_vm5 = vcmp.lt.u32.totalorder %v237_v61, 3865470566 }
  0xb8   :  { %v429_v0 = vmul.f32 1.1111112, %v141_v60  ;;  %v716_v2 = vadd.f32 %v620_v58, %v524_v63  ;;  %v238_v3 = vld [vmem:[#allocation7 + $0x2b0] sm:$0xff]  ;;  %v430_v4 = vmul.f32 1.1111112, %v142_v1  ;;  %v143_v6 = vld [vmem:[#allocation2 + $0x2b8] sm:$0xff] }
  0xb9   :  { %811 = vst [vmem:[#allocation8 + $0x298] sm:$0xff] %v715_v59  ;;  %v622_v5 = vld [vmem:[#allocation5 + $0x2b0] sm:$0xff]  ;;  %vm334_vm6 = vcmp.lt.u32.totalorder %v238_v3, 3865470566  ;;  %v239_v8 = vld [vmem:[#allocation7 + $0x2b8] sm:$0xff]  ;;  %v144_v13 = vld [vmem:[#allocation2 + $0x2c0] sm:$0xff] }
  0xba   :  { %v525_v7 = vsel %vm333_vm5, %v429_v0, 0.0  ;;  %v431_v9 = vmul.f32 1.1111112, %v143_v6  ;;  %812 = vst [vmem:[#allocation8 + $0x2a0] sm:$0xff] %v716_v2  ;;  %v526_v11 = vsel %vm334_vm6, %v430_v4, 0.0  ;;  %v623_v12 = vld [vmem:[#allocation5 + $0x2b8] sm:$0xff] }
  0xbb   :  { %v717_v10 = vadd.f32 %v621_v62, %v525_v7  ;;  %vm335_vm7 = vcmp.lt.u32.totalorder %v239_v8, 3865470566  ;;  %v240_v14 = vld [vmem:[#allocation7 + $0x2c0] sm:$0xff]  ;;  %v718_v15 = vadd.f32 %v622_v5, %v526_v11  ;;  %v432_v17 = vmul.f32 1.1111112, %v144_v13  ;;  %v145_v20 = vld [vmem:[#allocation2 + $0x2c8] sm:$0xff] }
  0xbc   :  { %v527_v16 = vsel %vm335_vm7, %v431_v9, 0.0  ;;  %vm336_vm8 = vcmp.lt.u32.totalorder %v240_v14, 3865470566  ;;  %v624_v18 = vld [vmem:[#allocation5 + $0x2c0] sm:$0xff]  ;;  %v241_v21 = vld [vmem:[#allocation7 + $0x2c8] sm:$0xff]  ;;  %v146_v25 = vld [vmem:[#allocation2 + $0x2d0] sm:$0xff] }
  0xbd   :  { %813 = vst [vmem:[#allocation8 + $0x2a8] sm:$0xff] %v717_v10  ;;  %v719_v19 = vadd.f32 %v623_v12, %v527_v16  ;;  %v625_v22 = vld [vmem:[#allocation5 + $0x2c8] sm:$0xff]  ;;  %814 = vst [vmem:[#allocation8 + $0x2b0] sm:$0xff] %v718_v15  ;;  %v528_v23 = vsel %vm336_vm8, %v432_v17, 0.0  ;;  %vm337_vm9 = vcmp.lt.u32.totalorder %v241_v21, 3865470566 }
  0xbe   :  { %v433_v24 = vmul.f32 1.1111112, %v145_v20  ;;  %v720_v26 = vadd.f32 %v624_v18, %v528_v23  ;;  %v242_v27 = vld [vmem:[#allocation7 + $0x2d0] sm:$0xff]  ;;  %v434_v28 = vmul.f32 1.1111112, %v146_v25  ;;  %v147_v30 = vld [vmem:[#allocation2 + $0x2d8] sm:$0xff] }
  0xbf   :  { %815 = vst [vmem:[#allocation8 + $0x2b8] sm:$0xff] %v719_v19  ;;  %v626_v29 = vld [vmem:[#allocation5 + $0x2d0] sm:$0xff]  ;;  %vm338_vm10 = vcmp.lt.u32.totalorder %v242_v27, 3865470566  ;;  %v243_v32 = vld [vmem:[#allocation7 + $0x2d8] sm:$0xff]  ;;  %v148_v37 = vld [vmem:[#allocation2 + $0x2e0] sm:$0xff] }
  0xc0   :  { %v529_v31 = vsel %vm337_vm9, %v433_v24, 0.0  ;;  %v435_v33 = vmul.f32 1.1111112, %v147_v30  ;;  %816 = vst [vmem:[#allocation8 + $0x2c0] sm:$0xff] %v720_v26  ;;  %v530_v35 = vsel %vm338_vm10, %v434_v28, 0.0  ;;  %v627_v36 = vld [vmem:[#allocation5 + $0x2d8] sm:$0xff] }
  0xc1   :  { %v721_v34 = vadd.f32 %v625_v22, %v529_v31  ;;  %vm339_vm11 = vcmp.lt.u32.totalorder %v243_v32, 3865470566  ;;  %v244_v38 = vld [vmem:[#allocation7 + $0x2e0] sm:$0xff]  ;;  %v722_v39 = vadd.f32 %v626_v29, %v530_v35  ;;  %v436_v41 = vmul.f32 1.1111112, %v148_v37  ;;  %v149_v44 = vld [vmem:[#allocation2 + $0x2e8] sm:$0xff] }
  0xc2   :  { %v531_v40 = vsel %vm339_vm11, %v435_v33, 0.0  ;;  %vm340_vm12 = vcmp.lt.u32.totalorder %v244_v38, 3865470566  ;;  %v628_v42 = vld [vmem:[#allocation5 + $0x2e0] sm:$0xff]  ;;  %v245_v45 = vld [vmem:[#allocation7 + $0x2e8] sm:$0xff]  ;;  %v150_v49 = vld [vmem:[#allocation2 + $0x2f0] sm:$0xff] }
  0xc3   :  { %817 = vst [vmem:[#allocation8 + $0x2c8] sm:$0xff] %v721_v34  ;;  %v723_v43 = vadd.f32 %v627_v36, %v531_v40  ;;  %v629_v46 = vld [vmem:[#allocation5 + $0x2e8] sm:$0xff]  ;;  %818 = vst [vmem:[#allocation8 + $0x2d0] sm:$0xff] %v722_v39  ;;  %v532_v47 = vsel %vm340_vm12, %v436_v41, 0.0  ;;  %vm341_vm13 = vcmp.lt.u32.totalorder %v245_v45, 3865470566 }
  0xc4   :  { %v437_v48 = vmul.f32 1.1111112, %v149_v44  ;;  %v724_v50 = vadd.f32 %v628_v42, %v532_v47  ;;  %v246_v51 = vld [vmem:[#allocation7 + $0x2f0] sm:$0xff]  ;;  %v438_v52 = vmul.f32 1.1111112, %v150_v49  ;;  %v151_v54 = vld [vmem:[#allocation2 + $0x2f8] sm:$0xff] }
  0xc5   :  { %819 = vst [vmem:[#allocation8 + $0x2d8] sm:$0xff] %v723_v43  ;;  %v630_v53 = vld [vmem:[#allocation5 + $0x2f0] sm:$0xff]  ;;  %vm342_vm14 = vcmp.lt.u32.totalorder %v246_v51, 3865470566  ;;  %v247_v56 = vld [vmem:[#allocation7 + $0x2f8] sm:$0xff] }
  0xc6   :  { %v533_v55 = vsel %vm341_vm13, %v437_v48, 0.0  ;;  %v439_v57 = vmul.f32 1.1111112, %v151_v54  ;;  %820 = vst [vmem:[#allocation8 + $0x2e0] sm:$0xff] %v724_v50  ;;  %v534_v59 = vsel %vm342_vm14, %v438_v52, 0.0  ;;  %v631_v60 = vld [vmem:[#allocation5 + $0x2f8] sm:$0xff] }
  0xc7   :  { %v725_v58 = vadd.f32 %v629_v46, %v533_v55  ;;  %vm343_vm15 = vcmp.lt.u32.totalorder %v247_v56, 3865470566  ;;  %v726_v61 = vadd.f32 %v630_v53, %v534_v59 }
  0xc8   :  { %v535_v62 = vsel %vm343_vm15, %v439_v57, 0.0 }
  0xc9   :  { %821 = vst [vmem:[#allocation8 + $0x2e8] sm:$0xff] %v725_v58  ;;  %v727_v63 = vadd.f32 %v631_v60, %v535_v62  ;;  %822 = vst [vmem:[#allocation8 + $0x2f0] sm:$0xff] %v726_v61 }
  0xcb   :  { %823 = vst [vmem:[#allocation8 + $0x2f8] sm:$0xff] %v727_v63 }
  0xcc   :  { %925 = shalt.err (!%p922_p0)
}
  0xcd   :  { %s926_s27 = scalar_lea.hbm %s1038_s3, 12288 }
  0xce   :  { %p927_p1 = scmp.ne.s32.totalorder %s1038_s3, %s926_s27  ;;  %p930_p2 = scmp.lt.u32.totalorder %s926_s27, %s1038_s3 }
  0xd0   :  { %p932_p3 = pnand %p930_p2, %p927_p1 }
  0xd2   :  { %935 = shalt.err (!%p932_p3)
}
  0xd3   :  { %835 = dma.vmem_to_hbm [thread:$0]  %s830_s21, 12288, %s1038_s3, [#allocation4], %s944_s24, %s944_s24, %s945_s25  }
  0xd4   :  { %940 = dma.done.wait [#allocation4], 12288  }
  0xd5   :  { %941 = vsyncadd [#allocation4], 4294955008 }
  0xd6   :  { %839 = vsyncpa [#allocation3], 1 }
  0xd7   :  { %840 = vsyncpa [#allocation6], 1 }
  0xd8   :  { %841 = vsyncpa [#allocation4], 1 }

</bundles_post_ra>
